<compile_context>
chip_gen: v6e
topology: v6e:2x2x1
jax: 0.10.0
libtpu: 0.0.40
codegen_flags: <defaults>
</compile_context>

<pallas_src>
import numpy as np
import jax
import jax.numpy as jnp
from jax import lax
from jax.experimental import pallas as pl
from jax.experimental.pallas import tpu as pltpu

KH = 5          # conv1 kernel height
K2 = 7          # conv2 kernel size
C1 = 4          # conv1 out channels
C2 = 6          # conv2 out channels
FC1 = 64        # fc1 hidden size
OUT_LANES = 128  # lane-dense output width


# ----------------------------------------------------------------------------
# Wrapper-side weight packing (plain JAX; runs once under jit)
# ----------------------------------------------------------------------------
def _conv_band_matrix(w_taps, n_in, n_out, pad):
    """w_taps: (K, Cin, Cout).  Returns M of shape (n_in*Cin, n_out*Cout) with
    M[t*Cin + c, u*Cout + d] = w_taps[t - u + pad, c, d] when that tap index is
    in [0, K), else 0 — i.e. a zero-padded 'same' convolution as one matmul."""
    K, Cin, Cout = w_taps.shape
    t = np.arange(n_in)[:, None]
    u = np.arange(n_out)[None, :]
    k = t - u + pad                                   # (n_in, n_out)
    valid = (k >= 0) & (k < K)
    gathered = w_taps[np.clip(k, 0, K - 1)]           # (n_in, n_out, Cin, Cout)
    blocks = jnp.where(valid[:, :, None, None], gathered, 0.0)
    return blocks.transpose(0, 2, 1, 3).reshape(n_in * Cin, n_out * Cout)


def _fold_pool2(M, n_out, cout, channel_major):
    """Reorder the output columns of a conv matrix M (columns ordered
    (time, channel)) into [even-time half | odd-time half] so that
    max_pool1d(kernel=2, stride=2) becomes an elementwise max of two
    contiguous column halves.  If channel_major, each half is ordered
    (channel, pooled-time) to reproduce PyTorch's channel-major flatten."""
    rows = M.shape[0]
    Mr = M.reshape(rows, n_out // 2, 2, cout)
    even, odd = Mr[:, :, 0, :], Mr[:, :, 1, :]
    if channel_major:
        even = even.transpose(0, 2, 1)
        odd = odd.transpose(0, 2, 1)
    return jnp.concatenate([even.reshape(rows, -1), odd.reshape(rows, -1)],
                           axis=1)


# ----------------------------------------------------------------------------
# Kernel: one batch block per grid step, everything 2-D, 4 matmuls total
# ----------------------------------------------------------------------------
def cnn_kernel(x_ref, w1_ref, b1_ref, w2_ref, b2_ref,
               wfc1_ref, bfc1_ref, wfc2_ref, bfc2_ref, out_ref):
    x = x_ref[...]                                              # (Bblk, H*W)

    # conv1 (+ bias), pooling folded into [even | odd] column halves
    y1 = jnp.dot(x, w1_ref[...], preferred_element_type=jnp.float32) + b1_ref[...]
    h1 = y1.shape[1] // 2
    p1 = jnp.maximum(jnp.maximum(y1[:, :h1], y1[:, h1:]), 0.0)  # (Bblk, T*C1)

    # conv2 (+ bias), pooling + channel-major flatten folded into columns
    y2 = jnp.dot(p1, w2_ref[...], preferred_element_type=jnp.float32) + b2_ref[...]
    h2 = y2.shape[1] // 2
    p2 = jnp.maximum(jnp.maximum(y2[:, :h2], y2[:, h2:]), 0.0)  # (Bblk, Th*C2)

    # fc1 + relu  (dropout = identity in eval mode)
    z1 = jnp.maximum(
        jnp.dot(p2, wfc1_ref[...], preferred_element_type=jnp.float32)
        + bfc1_ref[...], 0.0)                                   # (Bblk, 64)

    # fc2 (padded to 128 output lanes for a lane-dense store) + sigmoid
    z2 = jnp.dot(z1, wfc2_ref[...], preferred_element_type=jnp.float32) + bfc2_ref[...]
    out_ref[...] = 1.0 / (1.0 + jnp.exp(-z2))                   # (Bblk, 128)


# ----------------------------------------------------------------------------
# Wrapper
# ----------------------------------------------------------------------------
def cnn_forward(x, tparams, block_b=512):
    """x: (B, H, W) float32.  tparams in the PyTorch layouts."""
    W1, b1, W2, b2, Wfc1, bfc1, Wfc2, bfc2 = tparams
    B, H, Win = x.shape
    assert H % 4 == 0
    T, Th = H // 2, H // 4

    # ---- fold conv taps + pooling parity + flatten order into dense weights
    w1taps = jnp.transpose(W1[:, 0], (1, 2, 0))                 # (KH, W, C1)
    w2taps = jnp.transpose(W2, (2, 1, 0))                       # (K2, C1, C2)
    A1 = _conv_band_matrix(w1taps, H, H, KH // 2)               # (H*W, H*C1)
    A2 = _conv_band_matrix(w2taps, T, T, K2 // 2)               # (T*C1, T*C2)
    w1big = _fold_pool2(A1, H, C1, channel_major=False)         # (H*W, 2*T*C1)
    w2big = _fold_pool2(A2, T, C2, channel_major=True)          # (T*C1, 2*Th*C2)
    b1big = jnp.tile(b1, 2 * T).reshape(1, -1)                  # (1, 2*T*C1)
    b2big = jnp.tile(jnp.repeat(b2, Th), 2).reshape(1, -1)      # (1, 2*Th*C2)
    wfc1 = jnp.transpose(Wfc1)                                  # (Th*C2, 64)
    bfc1k = bfc1.reshape(1, FC1)
    wfc2p = jnp.pad(jnp.transpose(Wfc2), ((0, 0), (0, OUT_LANES - 1)))  # (64, 128)
    bfc2p = jnp.pad(bfc2.reshape(1, 1), ((0, 0), (0, OUT_LANES - 1)))   # (1, 128)

    # ---- batch blocking: many samples per grid step, padded to a multiple
    Bblk = min(block_b, ((B + 7) // 8) * 8)
    Bpad = ((B + Bblk - 1) // Bblk) * Bblk
    xflat = jnp.pad(x.reshape(B, H * Win), ((0, Bpad - B), (0, 0)))

    weights = (w1big, b1big, w2big, b2big, wfc1, bfc1k, wfc2p, bfc2p)
    out = pl.pallas_call(
        cnn_kernel,
        out_shape=jax.ShapeDtypeStruct((Bpad, OUT_LANES), jnp.float32),
        grid=(Bpad // Bblk,),
        in_specs=[pl.BlockSpec((Bblk, H * Win), lambda b: (b, 0))]
                 + [pl.BlockSpec(w.shape, lambda b: (0, 0)) for w in weights],
        out_specs=pl.BlockSpec((Bblk, OUT_LANES), lambda b: (b, 0)),
        compiler_params=pltpu.CompilerParams(dimension_semantics=("parallel",)),
    )(xflat, *weights)
    return out[:B, :1]


# ----------------------------------------------------------------------------
# Pure-JAX (XLA) replica of the PyTorch forward, for verification
# ----------------------------------------------------------------------------
def torch_reference(x, tparams):
    W1, b1, W2, b2, Wfc1, bfc1, Wfc2, bfc2 = tparams
    B, H, _ = x.shape
    xi = x[:, None, :, :]                                       # (B,1,H,W)
    y = lax.conv_general_dilated(xi, W1, (1, 1), ((2, 2), (0, 0)),
                                 dimension_numbers=('NCHW', 'OIHW', 'NCHW'))
    y = (y + b1[None, :, None, None]).reshape(B, C1, H)
    y = jnp.maximum(jnp.max(y.reshape(B, C1, H // 2, 2), axis=-1), 0.0)
    y2 = lax.conv_general_dilated(y, W2, (1,), ((3, 3),),
                                  dimension_numbers=('NCH', 'OIH', 'NCH'))
    y2 = y2 + b2[None, :, None]
    y2 = jnp.maximum(jnp.max(y2.reshape(B, C2, H // 4, 2), axis=-1), 0.0)
    flat = y2.reshape(B, -1)                                    # channel-major
    z1 = jnp.maximum(flat @ Wfc1.T + bfc1, 0.0)
    z2 = z1 @ Wfc2.T + bfc2
    return jax.nn.sigmoid(z2)


if __name__ == "__main__":
    B, H, Win = 2, 16, 8        # input_h=16, input_w=8
    key = jax.random.PRNGKey(0)
    ks = jax.random.split(key, 9)

    def uinit(k, shape, fan_in):
        bound = 1.0 / np.sqrt(fan_in)
        return jax.random.uniform(k, shape, jnp.float32, -bound, bound)

    tparams = (
        uinit(ks[0], (C1, 1, KH, Win), KH * Win),       # conv1.weight
        uinit(ks[1], (C1,), KH * Win),                  # conv1.bias
        uinit(ks[2], (C2, C1, K2), C1 * K2),            # conv2.weight
        uinit(ks[3], (C2,), C1 * K2),                   # conv2.bias
        uinit(ks[4], (FC1, H // 4 * C2), H // 4 * C2),  # fc1.weight
        uinit(ks[5], (FC1,), H // 4 * C2),              # fc1.bias
        uinit(ks[6], (1, FC1), FC1),                    # fc2.weight
        uinit(ks[7], (1,), FC1),                        # fc2.bias
    )
    x = jax.random.normal(ks[8], (B, H, Win), jnp.float32)

    out = jax.block_until_ready(jax.jit(cnn_forward)(x, tparams))
    ref = jax.block_until_ready(torch_reference(x, tparams))

    assert out.shape == (B, 1), out.shape
    assert jnp.allclose(out, ref, atol=1e-5, rtol=1e-5), (out, ref)
    print("KERNEL_OK")
</pallas_src>

<mosaic_0001>
module attributes {stable_mosaic.version = 11 : i64} {
  func.func @cnn_kernel(%arg0: i32, %arg1: memref<8x128xf32, #tpu.memory_space<vmem>>, %arg2: memref<128x64xf32, #tpu.memory_space<vmem>>, %arg3: memref<1x64xf32, #tpu.memory_space<vmem>>, %arg4: memref<32x48xf32, #tpu.memory_space<vmem>>, %arg5: memref<1x48xf32, #tpu.memory_space<vmem>>, %arg6: memref<24x64xf32, #tpu.memory_space<vmem>>, %arg7: memref<1x64xf32, #tpu.memory_space<vmem>>, %arg8: memref<64x128xf32, #tpu.memory_space<vmem>>, %arg9: memref<1x128xf32, #tpu.memory_space<vmem>>, %arg10: memref<8x128xf32, #tpu.memory_space<vmem>>) attributes {dimension_semantics = [#tpu.dimension_semantics<parallel>], iteration_bounds = array<i64: 1>, scalar_prefetch = 0 : i64, scratch_operands = 0 : i64, tpu.core_type = #tpu.core_type<tc>, window_params = [{transform_indices = @transform_0, window_bounds = array<i64: 8, 128>}, {pipeline_mode = #tpu.pipeline_mode<synchronous>, transform_indices = @transform_1, window_bounds = array<i64: 128, 64>}, {pipeline_mode = #tpu.pipeline_mode<synchronous>, transform_indices = @transform_2, window_bounds = array<i64: 1, 64>}, {pipeline_mode = #tpu.pipeline_mode<synchronous>, transform_indices = @transform_3, window_bounds = array<i64: 32, 48>}, {pipeline_mode = #tpu.pipeline_mode<synchronous>, transform_indices = @transform_4, window_bounds = array<i64: 1, 48>}, {pipeline_mode = #tpu.pipeline_mode<synchronous>, transform_indices = @transform_5, window_bounds = array<i64: 24, 64>}, {pipeline_mode = #tpu.pipeline_mode<synchronous>, transform_indices = @transform_6, window_bounds = array<i64: 1, 64>}, {pipeline_mode = #tpu.pipeline_mode<synchronous>, transform_indices = @transform_7, window_bounds = array<i64: 64, 128>}, {pipeline_mode = #tpu.pipeline_mode<synchronous>, transform_indices = @transform_8, window_bounds = array<i64: 1, 128>}, {transform_indices = @transform_9, window_bounds = array<i64: 8, 128>}]} {
    %c0 = arith.constant 0 : index
    %c0_0 = arith.constant 0 : index
    %0 = vector.load %arg1[%c0, %c0_0] : memref<8x128xf32, #tpu.memory_space<vmem>>, vector<8x128xf32>
    %c0_1 = arith.constant 0 : index
    %c0_2 = arith.constant 0 : index
    %1 = vector.load %arg2[%c0_1, %c0_2] : memref<128x64xf32, #tpu.memory_space<vmem>>, vector<128x64xf32>
    %cst = arith.constant dense<0.000000e+00> : vector<8x64xf32>
    %2 = tpu.matmul %0, %1, %cst {dimension_numbers = #tpu.dot_dimension_numbers<[1], [0], [0], [1], [0, 0, 1, 1], [], []>} : vector<8x128xf32>, vector<128x64xf32>, vector<8x64xf32> -> vector<8x64xf32>
    %c0_3 = arith.constant 0 : index
    %c0_4 = arith.constant 0 : index
    %3 = vector.load %arg3[%c0_3, %c0_4] : memref<1x64xf32, #tpu.memory_space<vmem>>, vector<1x64xf32>
    %4 = vector.broadcast %3 : vector<1x64xf32> to vector<8x64xf32>
    %5 = arith.addf %2, %4 : vector<8x64xf32>
    %6 = vector.extract_strided_slice %5 {offsets = [0, 0], sizes = [8, 32], strides = [1, 1]} : vector<8x64xf32> to vector<8x32xf32>
    %7 = vector.extract_strided_slice %5 {offsets = [0, 32], sizes = [8, 32], strides = [1, 1]} : vector<8x64xf32> to vector<8x32xf32>
    %8 = arith.maximumf %6, %7 : vector<8x32xf32>
    %cst_5 = arith.constant 0.000000e+00 : f32
    %9 = vector.broadcast %cst_5 : f32 to vector<8x32xf32>
    %10 = arith.maximumf %8, %9 : vector<8x32xf32>
    %c0_6 = arith.constant 0 : index
    %c0_7 = arith.constant 0 : index
    %11 = vector.load %arg4[%c0_6, %c0_7] : memref<32x48xf32, #tpu.memory_space<vmem>>, vector<32x48xf32>
    %cst_8 = arith.constant dense<0.000000e+00> : vector<8x48xf32>
    %12 = tpu.matmul %10, %11, %cst_8 {dimension_numbers = #tpu.dot_dimension_numbers<[1], [0], [0], [1], [0, 0, 1, 1], [], []>} : vector<8x32xf32>, vector<32x48xf32>, vector<8x48xf32> -> vector<8x48xf32>
    %c0_9 = arith.constant 0 : index
    %c0_10 = arith.constant 0 : index
    %13 = vector.load %arg5[%c0_9, %c0_10] : memref<1x48xf32, #tpu.memory_space<vmem>>, vector<1x48xf32>
    %14 = vector.broadcast %13 : vector<1x48xf32> to vector<8x48xf32>
    %15 = arith.addf %12, %14 : vector<8x48xf32>
    %16 = vector.extract_strided_slice %15 {offsets = [0, 0], sizes = [8, 24], strides = [1, 1]} : vector<8x48xf32> to vector<8x24xf32>
    %17 = vector.extract_strided_slice %15 {offsets = [0, 24], sizes = [8, 24], strides = [1, 1]} : vector<8x48xf32> to vector<8x24xf32>
    %18 = arith.maximumf %16, %17 : vector<8x24xf32>
    %cst_11 = arith.constant 0.000000e+00 : f32
    %19 = vector.broadcast %cst_11 : f32 to vector<8x24xf32>
    %20 = arith.maximumf %18, %19 : vector<8x24xf32>
    %c0_12 = arith.constant 0 : index
    %c0_13 = arith.constant 0 : index
    %21 = vector.load %arg6[%c0_12, %c0_13] : memref<24x64xf32, #tpu.memory_space<vmem>>, vector<24x64xf32>
    %cst_14 = arith.constant dense<0.000000e+00> : vector<8x64xf32>
    %22 = tpu.matmul %20, %21, %cst_14 {dimension_numbers = #tpu.dot_dimension_numbers<[1], [0], [0], [1], [0, 0, 1, 1], [], []>} : vector<8x24xf32>, vector<24x64xf32>, vector<8x64xf32> -> vector<8x64xf32>
    %c0_15 = arith.constant 0 : index
    %c0_16 = arith.constant 0 : index
    %23 = vector.load %arg7[%c0_15, %c0_16] : memref<1x64xf32, #tpu.memory_space<vmem>>, vector<1x64xf32>
    %24 = vector.broadcast %23 : vector<1x64xf32> to vector<8x64xf32>
    %25 = arith.addf %22, %24 : vector<8x64xf32>
    %cst_17 = arith.constant 0.000000e+00 : f32
    %26 = vector.broadcast %cst_17 : f32 to vector<8x64xf32>
    %27 = arith.maximumf %25, %26 : vector<8x64xf32>
    %c0_18 = arith.constant 0 : index
    %c0_19 = arith.constant 0 : index
    %28 = vector.load %arg8[%c0_18, %c0_19] : memref<64x128xf32, #tpu.memory_space<vmem>>, vector<64x128xf32>
    %cst_20 = arith.constant dense<0.000000e+00> : vector<8x128xf32>
    %29 = tpu.matmul %27, %28, %cst_20 {dimension_numbers = #tpu.dot_dimension_numbers<[1], [0], [0], [1], [0, 0, 1, 1], [], []>} : vector<8x64xf32>, vector<64x128xf32>, vector<8x128xf32> -> vector<8x128xf32>
    %c0_21 = arith.constant 0 : index
    %c0_22 = arith.constant 0 : index
    %30 = vector.load %arg9[%c0_21, %c0_22] : memref<1x128xf32, #tpu.memory_space<vmem>>, vector<1x128xf32>
    %31 = vector.broadcast %30 : vector<1x128xf32> to vector<8x128xf32>
    %32 = arith.addf %29, %31 : vector<8x128xf32>
    %cst_23 = arith.constant 0.000000e+00 : f32
    %33 = vector.broadcast %cst_23 : f32 to vector<8x128xf32>
    %34 = arith.subf %33, %32 : vector<8x128xf32>
    %35 = math.exp %34 : vector<8x128xf32>
    %cst_24 = arith.constant 1.000000e+00 : f32
    %36 = vector.broadcast %cst_24 : f32 to vector<8x128xf32>
    %37 = arith.addf %36, %35 : vector<8x128xf32>
    %cst_25 = arith.constant 1.000000e+00 : f32
    %38 = vector.broadcast %cst_25 : f32 to vector<8x128xf32>
    %39 = arith.divf %38, %37 : vector<8x128xf32>
    %c0_26 = arith.constant 0 : index
    %c0_27 = arith.constant 0 : index
    %40 = vector.load %arg10[%c0_26, %c0_27] : memref<8x128xf32, #tpu.memory_space<vmem>>, vector<8x128xf32>
    tpu.vector_store %arg10[%c0_26, %c0_27], %39 {strides = array<i32>} : memref<8x128xf32, #tpu.memory_space<vmem>>, vector<8x128xf32>,
    return
  }
  func.func @transform_0(%arg0: i32) -> (i32, i32) {
    %c0_i32 = arith.constant 0 : i32
    %c0_i32_0 = arith.constant 0 : i32
    return %arg0, %c0_i32 : i32, i32
  }
  func.func @transform_1(%arg0: i32) -> (i32, i32) {
    %c0_i32 = arith.constant 0 : i32
    %c0_i32_0 = arith.constant 0 : i32
    %c0_i32_1 = arith.constant 0 : i32
    return %c0_i32, %c0_i32_0 : i32, i32
  }
  func.func @transform_2(%arg0: i32) -> (i32, i32) {
    %c0_i32 = arith.constant 0 : i32
    %c0_i32_0 = arith.constant 0 : i32
    %c0_i32_1 = arith.constant 0 : i32
    return %c0_i32, %c0_i32_0 : i32, i32
  }
  func.func @transform_3(%arg0: i32) -> (i32, i32) {
    %c0_i32 = arith.constant 0 : i32
    %c0_i32_0 = arith.constant 0 : i32
    %c0_i32_1 = arith.constant 0 : i32
    return %c0_i32, %c0_i32_0 : i32, i32
  }
  func.func @transform_4(%arg0: i32) -> (i32, i32) {
    %c0_i32 = arith.constant 0 : i32
    %c0_i32_0 = arith.constant 0 : i32
    %c0_i32_1 = arith.constant 0 : i32
    return %c0_i32, %c0_i32_0 : i32, i32
  }
  func.func @transform_5(%arg0: i32) -> (i32, i32) {
    %c0_i32 = arith.constant 0 : i32
    %c0_i32_0 = arith.constant 0 : i32
    %c0_i32_1 = arith.constant 0 : i32
    return %c0_i32, %c0_i32_0 : i32, i32
  }
  func.func @transform_6(%arg0: i32) -> (i32, i32) {
    %c0_i32 = arith.constant 0 : i32
    %c0_i32_0 = arith.constant 0 : i32
    %c0_i32_1 = arith.constant 0 : i32
    return %c0_i32, %c0_i32_0 : i32, i32
  }
  func.func @transform_7(%arg0: i32) -> (i32, i32) {
    %c0_i32 = arith.constant 0 : i32
    %c0_i32_0 = arith.constant 0 : i32
    %c0_i32_1 = arith.constant 0 : i32
    return %c0_i32, %c0_i32_0 : i32, i32
  }
  func.func @transform_8(%arg0: i32) -> (i32, i32) {
    %c0_i32 = arith.constant 0 : i32
    %c0_i32_0 = arith.constant 0 : i32
    %c0_i32_1 = arith.constant 0 : i32
    return %c0_i32, %c0_i32_0 : i32, i32
  }
  func.func @transform_9(%arg0: i32) -> (i32, i32) {
    %c0_i32 = arith.constant 0 : i32
    %c0_i32_0 = arith.constant 0 : i32
    return %arg0, %c0_i32 : i32, i32
  }
}

</mosaic_0001>

<bundles_post_ra>
// kernel: tile.12
= control target key start
LH: loop header
LB: loop body
LE: loop exit
PB: predicated region body
PF: predicated region fallthrough
CT: control target
= control target key end

     0   :  { %s28_s0 = inlined_call_operand.vmem [shape: f32[4], index: 0, kind: input, shape index: {}]   ;;  %s29_s1 = inlined_call_operand.vmem [shape: f32[16,4], index: 1, kind: output, shape index: {}]  }
   0x1   :  { %v4_v0 = vld [vmem:[%s28_s0] ss:$0 sm:$0xff] }
   0x2   :  { %5 = vst [vmem:[%s29_s1] sm:$0xff] %v4_v0  ;;  %8 = vst [vmem:[%s29_s1 + $0x8] sm:$0xff] %v4_v0 }

// kernel: tile.13
= control target key start
LH: loop header
LB: loop body
LE: loop exit
PB: predicated region body
PF: predicated region fallthrough
CT: control target
= control target key end

     0   :  { %s133_s10 = smov 60   ;;  %s134_s11 = smov 52   ;;  %vm3_vm0 = vcmask 31744   ;;  %vm9_vm1 = vcmask 523744   ;;  %vm15_vm2 = vcmask 490944   ;;  %vm21_vm3 = vcmask 458144   ;;  %s209_s0 = inlined_call_operand.vmem [shape: f32[16,4], index: 0, kind: input, shape index: {}]   ;;  %s210_s1 = inlined_call_operand.vmem [shape: f32[1,64], index: 1, kind: output, shape index: {}]  }
   0x1   :  { %v103_v0 = vld [vmem:[%s209_s0 + $0xf] sm:$0x1]   ;;  %v105_v1 = vld [vmem:[%s209_s0 + $0xd] sm:$0x1]   ;;  %v104_v2 = vld [vmem:[%s209_s0 + $0xe] sm:$0x1]  }
   0x2   :  { %7 = vrot.lane.b32.xlu0 %v103_v0, %s133_s10  ;;  %19 = vrot.lane.b32.xlu1 %v105_v1, %s134_s11  ;;  %v106_v3 = vld [vmem:[%s209_s0 + $0xc] sm:$0x1]   ;;  %s135_s16 = smov 56   ;;  %s136_s17 = smov 48   ;;  %v107_v4 = vld [vmem:[%s209_s0 + $0xb] sm:$0x1]  }
   0x3   :  { %v108_v5 = vld [vmem:[%s209_s0 + $0xa] sm:$0x1]   ;;  %v2_v6 = vld [vmem:[%s209_s0] sm:$0x1]   ;;  %s137_s24 = smov 44   ;;  %s138_s25 = smov 40  }
   0x4   :  { %4 = vst.msk [vmem:[#allocation0] sm:$0x1] %vm3_vm0, %v2_v6   ;;  %v109_v7 = vld [vmem:[%s209_s0 + $0x9] sm:$0x1]   ;;  %v110_v8 = vld [vmem:[%s209_s0 + $0x8] sm:$0x1]  }
   0x5   :  { %s139_s30 = smov 36   ;;  %s140_s2 = smov 32   ;;  %v111_v9 = vld [vmem:[%s209_s0 + $0x7] sm:$0x1]   ;;  %v112_v10 = vld [vmem:[%s209_s0 + $0x6] sm:$0x1]  }
   0x6   :  { %13 = vrot.lane.b32.xlu0 %v104_v2, %s135_s16  ;;  %25 = vrot.lane.b32.xlu1 %v106_v3, %s136_s17  ;;  %s141_s7 = smov 28   ;;  %s142_s8 = smov 24   ;;  %v113_v11 = vld [vmem:[%s209_s0 + $0x5] sm:$0x1]   ;;  %v114_v12 = vld [vmem:[%s209_s0 + $0x4] sm:$0x1]  }
   0x7   :  { %s143_s13 = smov 20   ;;  %s144_s14 = smov 16   ;;  %v115_v13 = vld [vmem:[%s209_s0 + $0x3] sm:$0x1]   ;;  %v116_v14 = vld [vmem:[%s209_s0 + $0x2] sm:$0x1]  }
   0x8   :  { %s145_s19 = smov 12   ;;  %s146_s20 = smov 8   ;;  %v117_v15 = vld [vmem:[%s209_s0 + $0x1] sm:$0x1]   ;;  %vm27_vm4 = vcmask 425344   ;;  %vm33_vm5 = vcmask 392544  }
   0x9   :  { %s147_s0 = smov 4   ;;  %vm39_vm6 = vcmask 359744   ;;  %vm45_vm7 = vcmask 326944   ;;  %vm51_vm8 = vcmask 294144   ;;  %vm57_vm9 = vcmask 261344  }
   0xa   :  { %31 = vrot.lane.b32.xlu0 %v107_v4, %s137_s24  ;;  %37 = vrot.lane.b32.xlu1 %v108_v5, %s138_s25  ;;  %vm63_vm10 = vcmask 228544   ;;  %vm69_vm11 = vcmask 195744   ;;  %vm75_vm12 = vcmask 162944   ;;  %vm81_vm13 = vcmask 130144  }
   0xb   :  { %vm87_vm14 = vcmask 97344   ;;  %vm93_vm15 = vcmask 64544  }
   0xe   :  { %43 = vrot.lane.b32.xlu0 %v109_v7, %s139_s30  ;;  %49 = vrot.lane.b32.xlu1 %v110_v8, %s140_s2 }
  0x12   :  { %55 = vrot.lane.b32.xlu0 %v111_v9, %s141_s7  ;;  %61 = vrot.lane.b32.xlu1 %v112_v10, %s142_s8 }
  0x16   :  { %67 = vrot.lane.b32.xlu0 %v113_v11, %s143_s13  ;;  %73 = vrot.lane.b32.xlu1 %v114_v12, %s144_s14 }
  0x1a   :  { %79 = vrot.lane.b32.xlu0 %v115_v13, %s145_s19  ;;  %85 = vrot.lane.b32.xlu1 %v116_v14, %s146_s20 }
  0x1e   :  { %91 = vrot.lane.b32.xlu0 %v117_v15, %s147_s0 }
  0x74   :  { %v8_v16 = vpop.permute.xlu0 %7   ;;  %v20_v17 = vpop.permute.xlu1 %19  }
  0x75   :  { %10 = vst.msk [vmem:[#allocation0] sm:$0x1] %vm9_vm1, %v8_v16  }
  0x78   :  { %v14_v18 = vpop.permute.xlu0 %13   ;;  %v26_v19 = vpop.permute.xlu1 %25  }
  0x79   :  { %16 = vst.msk [vmem:[#allocation0] sm:$0x1] %vm15_vm2, %v14_v18  }
  0x7a   :  { %22 = vst.msk [vmem:[#allocation0] sm:$0x1] %vm21_vm3, %v20_v17  }
  0x7b   :  { %28 = vst.msk [vmem:[#allocation0] sm:$0x1] %vm27_vm4, %v26_v19  }
  0x7c   :  { %v32_v20 = vpop.permute.xlu0 %31   ;;  %v38_v21 = vpop.permute.xlu1 %37  }
  0x7d   :  { %34 = vst.msk [vmem:[#allocation0] sm:$0x1] %vm33_vm5, %v32_v20  }
  0x7e   :  { %40 = vst.msk [vmem:[#allocation0] sm:$0x1] %vm39_vm6, %v38_v21  }
  0x80   :  { %v44_v22 = vpop.permute.xlu0 %43   ;;  %v50_v23 = vpop.permute.xlu1 %49  }
  0x81   :  { %46 = vst.msk [vmem:[#allocation0] sm:$0x1] %vm45_vm7, %v44_v22  }
  0x82   :  { %52 = vst.msk [vmem:[#allocation0] sm:$0x1] %vm51_vm8, %v50_v23  }
  0x84   :  { %v56_v24 = vpop.permute.xlu0 %55   ;;  %v62_v25 = vpop.permute.xlu1 %61  }
  0x85   :  { %58 = vst.msk [vmem:[#allocation0] sm:$0x1] %vm57_vm9, %v56_v24  }
  0x86   :  { %64 = vst.msk [vmem:[#allocation0] sm:$0x1] %vm63_vm10, %v62_v25  }
  0x88   :  { %v68_v26 = vpop.permute.xlu0 %67   ;;  %v74_v27 = vpop.permute.xlu1 %73  }
  0x89   :  { %70 = vst.msk [vmem:[#allocation0] sm:$0x1] %vm69_vm11, %v68_v26  }
  0x8a   :  { %76 = vst.msk [vmem:[#allocation0] sm:$0x1] %vm75_vm12, %v74_v27  }
  0x8c   :  { %v80_v28 = vpop.permute.xlu0 %79   ;;  %v86_v29 = vpop.permute.xlu1 %85  }
  0x8d   :  { %82 = vst.msk [vmem:[#allocation0] sm:$0x1] %vm81_vm13, %v80_v28  }
  0x8e   :  { %88 = vst.msk [vmem:[#allocation0] sm:$0x1] %vm87_vm14, %v86_v29  }
  0x90   :  { %v92_v30 = vpop.permute.xlu0 %91  }
  0x91   :  { %94 = vst.msk [vmem:[#allocation0] sm:$0x1] %vm93_vm15, %v92_v30  }
  0x98   :  { %v99_v31 = vld [vmem:[#allocation0] sm:$0x1] }
  0x99   :  { %102 = vst [vmem:[%s210_s1] sm:$0x1] %v99_v31 }

// kernel: tile.15
= control target key start
LH: loop header
LB: loop body
LE: loop exit
PB: predicated region body
PF: predicated region fallthrough
CT: control target
= control target key end

     0   :  { %s53_s10 = smov 20   ;;  %s54_s11 = smov 12   ;;  %vm3_vm0 = vcmask 31744   ;;  %vm9_vm1 = vcmask 195744   ;;  %vm15_vm2 = vcmask 162944   ;;  %vm21_vm3 = vcmask 130144   ;;  %s89_s0 = inlined_call_operand.vmem [shape: f32[6,4], index: 0, kind: input, shape index: {}]   ;;  %s90_s1 = inlined_call_operand.vmem [shape: f32[24], index: 1, kind: output, shape index: {}]  }
   0x1   :  { %v43_v0 = vld [vmem:[%s89_s0 + $0x5] sm:$0x1]   ;;  %v45_v1 = vld [vmem:[%s89_s0 + $0x3] sm:$0x1]   ;;  %v44_v2 = vld [vmem:[%s89_s0 + $0x4] sm:$0x1]  }
   0x2   :  { %7 = vrot.lane.b32.xlu0 %v43_v0, %s53_s10  ;;  %19 = vrot.lane.b32.xlu1 %v45_v1, %s54_s11  ;;  %v46_v3 = vld [vmem:[%s89_s0 + $0x2] sm:$0x1]   ;;  %v2_v4 = vld [vmem:[%s89_s0] sm:$0x1]   ;;  %s55_s18 = smov 16   ;;  %s56_s19 = smov 8  }
   0x3   :  { %4 = vst.msk [vmem:[#allocation0] sm:$0x1] %vm3_vm0, %v2_v4   ;;  %v47_v5 = vld [vmem:[%s89_s0 + $0x1] sm:$0x1]   ;;  %s57_s0 = smov 4   ;;  %vm27_vm4 = vcmask 97344  }
   0x4   :  { %vm33_vm5 = vcmask 64544  }
   0x6   :  { %13 = vrot.lane.b32.xlu0 %v44_v2, %s55_s18  ;;  %25 = vrot.lane.b32.xlu1 %v46_v3, %s56_s19 }
   0xa   :  { %31 = vrot.lane.b32.xlu0 %v47_v5, %s57_s0 }
  0x74   :  { %v8_v6 = vpop.permute.xlu0 %7   ;;  %v20_v7 = vpop.permute.xlu1 %19  }
  0x75   :  { %10 = vst.msk [vmem:[#allocation0] sm:$0x1] %vm9_vm1, %v8_v6  }
  0x78   :  { %v14_v8 = vpop.permute.xlu0 %13   ;;  %v26_v9 = vpop.permute.xlu1 %25  }
  0x79   :  { %16 = vst.msk [vmem:[#allocation0] sm:$0x1] %vm15_vm2, %v14_v8  }
  0x7a   :  { %22 = vst.msk [vmem:[#allocation0] sm:$0x1] %vm21_vm3, %v20_v7  }
  0x7b   :  { %28 = vst.msk [vmem:[#allocation0] sm:$0x1] %vm27_vm4, %v26_v9  }
  0x7c   :  { %v32_v10 = vpop.permute.xlu0 %31  }
  0x7d   :  { %34 = vst.msk [vmem:[#allocation0] sm:$0x1] %vm33_vm5, %v32_v10  }
  0x84   :  { %v39_v11 = vld [vmem:[#allocation0] sm:$0x1] }
  0x85   :  { %42 = vst [vmem:[%s90_s1] sm:$0x1] %v39_v11 }

// kernel: tile.16
= control target key start
LH: loop header
LB: loop body
LE: loop exit
PB: predicated region body
PF: predicated region fallthrough
CT: control target
= control target key end

     0   :  { %s22_s0 = inlined_call_operand.vmem [shape: f32[24], index: 0, kind: input, shape index: {}]   ;;  %s23_s1 = inlined_call_operand.vmem [shape: f32[2,24], index: 1, kind: output, shape index: {}]  }
   0x1   :  { %v4_v0 = vld [vmem:[%s22_s0] ss:$0 sm:$0xff] }
   0x2   :  { %5 = vst [vmem:[%s23_s1] sm:$0x3] %v4_v0 }

// kernel: tile.17
= control target key start
LH: loop header
LB: loop body
LE: loop exit
PB: predicated region body
PF: predicated region fallthrough
CT: control target
= control target key end

     0   :  { %vm8_vm0 = vcmask 195584   ;;  %vm14_vm1 = vcmask 392384   ;;  %s42_s0 = inlined_call_operand.vmem [shape: f32[2,24], index: 0, kind: input, shape index: {}]   ;;  %s43_s1 = inlined_call_operand.vmem [shape: f32[1,48], index: 1, kind: output, shape index: {}]  }
   0x1   :  { %v5_v0 = vld [vmem:[%s42_s0] sm:$0x3]  ;;  %s25_s0 = smov 24  }
   0x2   :  { %6 = vst [vmem:[#allocation1] sm:$0x3] %v5_v0 }
   0x9   :  { %v11_v1 = vld [vmem:[#allocation1 + $0x1] sm:$0x1]   ;;  %v7_v2 = vld [vmem:[#allocation1] sm:$0x1]  }
   0xa   :  { %12 = vrot.lane.b32.xlu0 %v11_v1, %s25_s0  ;;  %9 = vst.msk [vmem:[#allocation0] sm:$0x1] %vm8_vm0, %v7_v2  }
  0x7c   :  { %v13_v3 = vpop.permute.xlu0 %12  }
  0x7d   :  { %15 = vst.msk [vmem:[#allocation0] sm:$0x1] %vm14_vm1, %v13_v3  }
  0x84   :  { %v20_v4 = vld [vmem:[#allocation0] sm:$0x1] }
  0x85   :  { %23 = vst [vmem:[%s43_s1] sm:$0x1] %v20_v4 }

// kernel: cnn_forward.1
= control target key start
LH: loop header
LB: loop body
LE: loop exit
PB: predicated region body
PF: predicated region fallthrough
CT: control target
= control target key end

     0   :  { %v532_v0 = vmov 0.0   ;;  %vm533_vm0 = vmmov 0   ;;  %s534_s30 = smov 96   ;;  %vm143_vm1 = vcmask 261120   ;;  %s535_s16 = smov 104   ;;  %vm233_vm2 = vcmask 195584   ;;  %s736_s1 = inlined_call_operand.vmem [shape: f32[128,64], index: 1, kind: input, shape index: {}]   ;;  %s737_s0 = inlined_call_operand.vmem [shape: f32[8,128], index: 0, kind: input, shape index: {}]   ;;  %s738_s3 = inlined_call_operand.vmem [shape: f32[32,48], index: 3, kind: input, shape index: {}]   ;;  %s739_s2 = inlined_call_operand.vmem [shape: f32[1,64], index: 2, kind: input, shape index: {}]   ;;  %s740_s5 = inlined_call_operand.vmem [shape: f32[24,64], index: 5, kind: input, shape index: {}]   ;;  %s741_s4 = inlined_call_operand.vmem [shape: f32[1,48], index: 4, kind: input, shape index: {}]   ;;  %s742_s7 = inlined_call_operand.vmem [shape: f32[64,128], index: 7, kind: input, shape index: {}]   ;;  %s743_s6 = inlined_call_operand.vmem [shape: f32[1,64], index: 6, kind: input, shape index: {}]   ;;  %s744_s8 = inlined_call_operand.vmem [shape: f32[1,128], index: 8, kind: input, shape index: {}]   ;;  %s745_s9 = inlined_call_operand.vmem [shape: f32[8,128], index: 9, kind: output, shape index: {}]  }
   0x1   :  { %450 = vmatprep.subr.mxu0 %v532_v0  ;;  %v48_v1 = vld [vmem:[%s736_s1 + $0x78] sm:$0xff]  ;;  %v47_v2 = vld [vmem:[%s736_s1 + $0x70] sm:$0xff]  ;;  %482 = vmatprep.mubr.msk.f32.mxu0 %vm533_vm0, %v532_v0  ;;  %v46_v3 = vld [vmem:[%s736_s1 + $0x68] sm:$0xff]  ;;  %vm323_vm3 = vcmask 523264  }
   0x2   :  { %451 = vmatpush3.msra.mxu0 %v48_v1  ;;  %485 = vmatprep.subr.mxu1 %v532_v0  ;;  %v45_v4 = vld [vmem:[%s736_s1 + $0x60] sm:$0xff]  ;;  %v44_v5 = vld [vmem:[%s736_s1 + $0x58] sm:$0xff]  ;;  %v43_v6 = vld [vmem:[%s736_s1 + $0x50] sm:$0xff] }
   0x3   :  { %452 = vmatprep.subr.mxu0 %v532_v0  ;;  %493 = vmatprep.mubr.msk.f32.mxu1 %vm533_vm0, %v532_v0  ;;  %v42_v7 = vld [vmem:[%s736_s1 + $0x48] sm:$0xff]  ;;  %v41_v8 = vld [vmem:[%s736_s1 + $0x40] sm:$0xff]  ;;  %v40_v9 = vld [vmem:[%s736_s1 + $0x38] sm:$0xff] }
   0x4   :  { %453 = vmatpush3.msra.mxu0 %v47_v2  ;;  %v39_v10 = vld [vmem:[%s736_s1 + $0x30] sm:$0xff]  ;;  %v38_v11 = vld [vmem:[%s736_s1 + $0x28] sm:$0xff]  ;;  %v37_v12 = vld [vmem:[%s736_s1 + $0x20] sm:$0xff] }
   0x5   :  { %454 = vmatprep.subr.mxu0 %v532_v0  ;;  %v36_v13 = vld [vmem:[%s736_s1 + $0x18] sm:$0xff]  ;;  %v35_v14 = vld [vmem:[%s736_s1 + $0x10] sm:$0xff]  ;;  %v34_v15 = vld [vmem:[%s736_s1 + $0x8] sm:$0xff] }
   0x6   :  { %455 = vmatpush3.msra.mxu0 %v46_v3  ;;  %v33_v16 = vld [vmem:[%s736_s1] sm:$0xff]  ;;  %v135_v18 = vld [vmem:[%s738_s3 + $0x18] sm:$0xff]  ;;  %v134_v19 = vld [vmem:[%s738_s3 + $0x10] sm:$0xff] }
   0x7   :  { %456 = vmatprep.subr.mxu0 %v532_v0  ;;  %v32_v17 = vld [vmem:[%s737_s0] sm:$0xff]  ;;  %486 = vmatpush3.msra.mxu1 %v135_v18  ;;  %v133_v20 = vld [vmem:[%s738_s3 + $0x8] sm:$0xff]  ;;  %v225_v29 = vld [vmem:[%s740_s5 + $0x10] sm:$0xff] }
   0x8   :  { %457 = vmatpush3.msra.mxu0 %v45_v4  ;;  %487 = vmatprep.subr.mxu1 %v532_v0  ;;  %v132_v21 = vld [vmem:[%s738_s3] sm:$0xff]  ;;  %v224_v30 = vld [vmem:[%s740_s5 + $0x8] sm:$0xff]  ;;  %v315_v39 = vld [vmem:[%s742_s7 + $0x38] sm:$0xff] }
   0x9   :  { %458 = vmatprep.subr.mxu0 %v532_v0  ;;  %488 = vmatpush3.msra.mxu1 %v134_v19  ;;  %v408_v22 = vld [vmem:[%s739_s2] ss:$0 sm:$0xff]  ;;  %v314_v40 = vld [vmem:[%s742_s7 + $0x30] sm:$0xff]  ;;  %v313_v41 = vld [vmem:[%s742_s7 + $0x28] sm:$0xff] }
   0xa   :  { %459 = vmatpush3.msra.mxu0 %v44_v5  ;;  %489 = vmatprep.subr.mxu1 %v532_v0  ;;  %v223_v31 = vld [vmem:[%s740_s5] sm:$0xff]  ;;  %v311_v43 = vld [vmem:[%s742_s7 + $0x18] sm:$0xff]  ;;  %v310_v44 = vld [vmem:[%s742_s7 + $0x10] sm:$0xff] }
   0xb   :  { %460 = vmatprep.subr.mxu0 %v532_v0  ;;  %490 = vmatpush3.msra.mxu1 %v133_v20  ;;  %v409_v32 = vld [vmem:[%s741_s4] ss:$0 sm:$0xff]  ;;  %v309_v45 = vld [vmem:[%s742_s7 + $0x8] sm:$0xff] }
   0xc   :  { %461 = vmatpush3.msra.mxu0 %v43_v6  ;;  %491 = vmatprep.subr.mxu1 %v532_v0  ;;  %v312_v42 = vld [vmem:[%s742_s7 + $0x20] sm:$0xff] }
   0xd   :  { %462 = vmatprep.subr.mxu0 %v532_v0  ;;  %492 = vmatpush3.msra.mxu1 %v132_v21  ;;  %v308_v46 = vld [vmem:[%s742_s7] sm:$0xff] }
   0xe   :  { %463 = vmatpush3.msra.mxu0 %v42_v7  ;;  %496 = vmatprep.subr.mxu1 %v532_v0  ;;  %v411_v47 = vld [vmem:[%s743_s6] ss:$0 sm:$0xff] }
   0xf   :  { %464 = vmatprep.subr.mxu0 %v532_v0  ;;  %v413_v52 = vld [vmem:[%s744_s8] ss:$0 sm:$0xff] }
  0x10   :  { %465 = vmatpush3.msra.mxu0 %v41_v8 }
  0x11   :  { %466 = vmatprep.subr.mxu0 %v532_v0 }
  0x12   :  { %467 = vmatpush3.msra.mxu0 %v40_v9 }
  0x13   :  { %468 = vmatprep.subr.mxu0 %v532_v0 }
  0x14   :  { %469 = vmatpush3.msra.mxu0 %v39_v10 }
  0x15   :  { %470 = vmatprep.subr.mxu0 %v532_v0 }
  0x16   :  { %471 = vmatpush3.msra.mxu0 %v38_v11 }
  0x17   :  { %472 = vmatprep.subr.mxu0 %v532_v0 }
  0x18   :  { %473 = vmatpush3.msra.mxu0 %v37_v12 }
  0x19   :  { %474 = vmatprep.subr.mxu0 %v532_v0 }
  0x1a   :  { %475 = vmatpush3.msra.mxu0 %v36_v13 }
  0x1b   :  { %476 = vmatprep.subr.mxu0 %v532_v0 }
  0x1c   :  { %477 = vmatpush3.msra.mxu0 %v35_v14 }
  0x1d   :  { %478 = vmatprep.subr.mxu0 %v532_v0 }
  0x1e   :  { %479 = vmatpush3.msra.mxu0 %v34_v15 }
  0x1f   :  { %480 = vmatprep.subr.mxu0 %v532_v0 }
  0x20   :  { %481 = vmatpush3.msra.mxu0 %v33_v16 }
  0x21   :  { %483 = vmatmul.mubr.f32.vlgmr.msra.gmra.mxu0 %v32_v17 }
  0xe1   :  { %v122_v23 = vpop.f32.mrf.mxu0 }
  0xe2   :  { %v123_v24 = vadd.f32 %v408_v22, %v122_v23 }
  0xe3   :  { %v484_v25 = vpop.f32.mrf.mxu0 }
  0xe4   :  { %127 = vrot.lane.b32.xlu0 %v123_v24, %s534_s30 }
 0x156   :  { %v128_v26 = vpop.permute.xlu0 %127 }
 0x157   :  { %v130_v27 = vmax.f32 %v123_v24, %v128_v26 }
 0x159   :  { %v131_v28 = vmax.f32 %v130_v27, 0.0 }
 0x15b   :  { %494 = vmatmul.mubr.msk.f32.vlgmr.msra.gmra.mxu1 %vm143_vm1, %v131_v28 }
 0x15c   :  { %502 = vmatprep.mubr.msk.f32.mxu1 %vm533_vm0, %v532_v0  ;;  %497 = vmatpush3.msra.mxu1 %v225_v29 }
 0x15d   :  { %498 = vmatprep.subr.mxu1 %v532_v0 }
 0x15e   :  { %499 = vmatpush3.msra.mxu1 %v224_v30 }
 0x15f   :  { %500 = vmatprep.subr.mxu1 %v532_v0 }
 0x160   :  { %501 = vmatpush3.msra.mxu1 %v223_v31 }
 0x161   :  { %505 = vmatprep.subr.mxu1 %v532_v0 }
 0x21b   :  { %v213_v33 = vpop.f32.mrf.mxu1 }
 0x21c   :  { %v214_v34 = vadd.f32 %v409_v32, %v213_v33 }
 0x21d   :  { %v495_v35 = vpop.f32.mrf.mxu1 }
 0x21e   :  { %218 = vrot.lane.b32.xlu0 %v214_v34, %s535_s16 }
 0x290   :  { %v219_v36 = vpop.permute.xlu0 %218 }
 0x291   :  { %v221_v37 = vmax.f32 %v214_v34, %v219_v36 }
 0x293   :  { %v222_v38 = vmax.f32 %v221_v37, 0.0 }
 0x295   :  { %503 = vmatmul.mubr.msk.f32.vlgmr.msra.gmra.mxu1 %vm233_vm2, %v222_v38 }
 0x296   :  { %506 = vmatpush3.msra.mxu1 %v315_v39  ;;  %521 = vmatprep.mubr.msk.f32.mxu1 %vm533_vm0, %v532_v0 }
 0x297   :  { %507 = vmatprep.subr.mxu1 %v532_v0 }
 0x298   :  { %508 = vmatpush3.msra.mxu1 %v314_v40 }
 0x299   :  { %509 = vmatprep.subr.mxu1 %v532_v0 }
 0x29a   :  { %510 = vmatpush3.msra.mxu1 %v313_v41 }
 0x29b   :  { %511 = vmatprep.subr.mxu1 %v532_v0 }
 0x29c   :  { %512 = vmatpush3.msra.mxu1 %v312_v42 }
 0x29d   :  { %513 = vmatprep.subr.mxu1 %v532_v0 }
 0x29e   :  { %514 = vmatpush3.msra.mxu1 %v311_v43 }
 0x29f   :  { %515 = vmatprep.subr.mxu1 %v532_v0 }
 0x2a0   :  { %516 = vmatpush3.msra.mxu1 %v310_v44 }
 0x2a1   :  { %517 = vmatprep.subr.mxu1 %v532_v0 }
 0x2a2   :  { %518 = vmatpush3.msra.mxu1 %v309_v45 }
 0x2a3   :  { %519 = vmatprep.subr.mxu1 %v532_v0 }
 0x2a4   :  { %520 = vmatpush3.msra.mxu1 %v308_v46 }
 0x355   :  { %v303_v48 = vpop.f32.mrf.mxu1 }
 0x356   :  { %v304_v49 = vadd.f32 %v411_v47, %v303_v48 }
 0x357   :  { %v504_v50 = vpop.f32.mrf.mxu1 }
 0x358   :  { %v307_v51 = vmax.f32 %v304_v49, 0.0 }
 0x35a   :  { %522 = vmatmul.mubr.msk.f32.vlgmr.msra.gmra.mxu1 %vm323_vm3, %v307_v51 }
 0x41a   :  { %v393_v53 = vpop.f32.mrf.mxu1 }
 0x41b   :  { %v394_v54 = vadd.f32 %v413_v52, %v393_v53 }
 0x41c   :  { %v523_v55 = vpop.f32.mrf.mxu1 }
 0x41d   :  { %v397_v56 = vsub.f32 0.0, %v394_v54 }
 0x41f   :  { %v398_v57 = vmul.f32 1.442695, %v397_v56 }
 0x421   :  { %528 = vpow2.f32 %v398_v57 }
 0x42e   :  { %v529_v58 = vpop.eup %528 }
 0x42f   :  { %v400_v59 = vadd.f32 1.0, %v529_v58 }
 0x431   :  { %530 = vrcp.f32 %v400_v59 }
 0x43e   :  { %v531_v60 = vpop.eup %530 }
 0x43f   :  { %403 = vst [vmem:[%s745_s9] sm:$0xff] %v531_v60 }

</bundles_post_ra>
